<compile_context>
chip_gen: v7x
topology: tpu7x:2x2x1
jax: 0.10.0
libtpu: 0.0.40
codegen_flags: <defaults>
</compile_context>

<pallas_src>
import math

import jax
import jax.numpy as jnp
from jax.experimental import pallas as pl
from jax.experimental.pallas import tpu as pltpu


_SUBLANE = 8
_LANE = 128
_STEP_BUDGET_ELEMS = (4 * 1024 * 1024) // 4   # ~4 MiB (f32) of x+out per grid step
_MAX_C_BLOCK = 2048                            # channels per step (multiple of 8/128)


def _round_up(v, m):
    return -(-v // m) * m


def _plan_blocks(B, C, N):
    """Pick block sizes (TB, C_blk, TN) and the grid (nb, nn, nc)."""
    # Channel chunking: all channels in one block unless C is large.
    if C <= _MAX_C_BLOCK:
        c_blk = C                      # equals the full dim -> always a legal block
    else:
        c_blk = _MAX_C_BLOCK           # multiple of 8 (and 128)
    nc = pl.cdiv(C, c_blk)
    ragged_c = (C % c_blk) != 0

    # VMEM sublane rows per (batch row, lane): the x block pads C_blk up to a
    # multiple of 8, and the (TB, 1, TN) output block pads its channel dim to 8.
    rows = _round_up(c_blk, _SUBLANE) + _SUBLANE

    # Lane tile: all of N if it fits the per-step budget, else the largest
    # multiple of 128 that does (partial last lane block is masked by Pallas).
    max_tn = max(_LANE, (_STEP_BUDGET_ELEMS // rows) // _LANE * _LANE)
    tn = N if N <= max_tn else max_tn
    nn = pl.cdiv(N, tn)

    # Batch rows per block: soak up the remaining per-step byte budget.
    tb = max(1, min(B, _STEP_BUDGET_ELEMS // (rows * tn)))
    nb = pl.cdiv(B, tb)

    # v7x has two TensorCores: keep >= 2 "parallel" grid steps when possible.
    if nb * nn == 1:
        if B >= 2:
            tb = (B + 1) // 2
            nb = pl.cdiv(B, tb)
        elif N >= 2 * _LANE:
            tn = _round_up(max(N // 2, 1), _LANE)
            nn = pl.cdiv(N, tn)

    return tb, c_blk, tn, nb, nn, nc, ragged_c


def _make_kernel(c_total, c_blk, ragged_c):
    def kernel(w_ref, b_ref, x_ref, o_ref):
        # w_ref: [C_blk, 1]       VMEM  (channel chunk of the conv weight)
        # b_ref: [1]              SMEM  (scalar bias)
        # x_ref: [TB, C_blk, TN]  VMEM  (input tile)
        # o_ref: [TB, 1, TN]      VMEM  (output tile, resident across the c axis)
        c = pl.program_id(2)

        # First channel chunk: initialise the resident output block with the bias.
        @pl.when(c == 0)
        def _init():
            o_ref[...] = jnp.zeros_like(o_ref) + b_ref[0]

        # VPU multiply with a column-broadcast weight -> exact f32, no MXU.
        prod = x_ref[...] * w_ref[...][None, :, :]          # (TB, C_blk, TN)

        if ragged_c:
            # Final channel chunk may run past C: mask the (garbage) product so
            # out-of-bounds channels/weights never contribute to the sum.
            ch = c * c_blk + jax.lax.broadcasted_iota(jnp.int32, (1, c_blk, 1), 1)
            prod = jnp.where(ch < c_total, prod, 0.0)

        # Sublane-axis reduction over the channel chunk, accumulated in f32
        # directly in the output block (its index_map ignores the c axis).
        o_ref[...] += jnp.sum(prod, axis=1, keepdims=True)

    return kernel


def fully_conv(x, weight, bias):
    """Pallas implementation of FullyConv.forward (nn.Conv2d(c, 1, 1)).

    :param x:      [B, C, 1, N] float32 (NCHW, H == 1)
    :param weight: [1, C, 1, 1] float32 (Conv2d weight)
    :param bias:   [1]          float32 (Conv2d bias)
    :return:       [B, 1, 1, N] float32
    """
    B, C, H, N = x.shape
    assert H == 1, "FullyConv expects H == 1"

    x3 = x.reshape(B, C, N)        # free contiguous squeeze -- no extra HBM pass
    w2 = weight.reshape(C, 1)      # free contiguous reshape
    b1 = bias.reshape(1)

    tb, c_blk, tn, nb, nn, nc, ragged_c = _plan_blocks(B, C, N)

    out3 = pl.pallas_call(
        _make_kernel(C, c_blk, ragged_c),
        out_shape=jax.ShapeDtypeStruct((B, 1, N), jnp.float32),
        grid=(nb, nn, nc),
        in_specs=[
            # Weight chunk [C_blk, 1]; constant block index when nc == 1 -> resident.
            pl.BlockSpec((c_blk, 1), lambda b, n, c: (c, 0)),
            # Bias: single scalar in SMEM.
            pl.BlockSpec((1,), lambda b, n, c: (0,),
                         memory_space=pltpu.MemorySpace.SMEM),
            # x tile: TB batch rows x C_blk channels x TN lanes per grid step.
            pl.BlockSpec((tb, c_blk, tn), lambda b, n, c: (b, c, n)),
        ],
        # Output tile is revisited (same block index) across the c axis -> it acts
        # as the f32 accumulator and is written back once per (b, n) tile.
        out_specs=pl.BlockSpec((tb, 1, tn), lambda b, n, c: (b, 0, n)),
        compiler_params=pltpu.CompilerParams(
            dimension_semantics=("parallel", "parallel", "arbitrary")),
    )(w2, b1, x3)

    return out3.reshape(B, 1, 1, N)


def _init_params(c, key):
    """Deterministic Conv2d(c, 1, 1) init (PyTorch-style kaiming uniform)."""
    kw, kb = jax.random.split(key)
    bound = 1.0 / math.sqrt(c)   # fan_in = c * 1 * 1
    weight = jax.random.uniform(kw, (1, c, 1, 1), jnp.float32, -bound, bound)
    bias = jax.random.uniform(kb, (1,), jnp.float32, -bound, bound)
    return weight, bias


def _reference(x, weight, bias):
    """Pure-JAX reference, same math as nn.Conv2d(c, 1, 1) in f32."""
    B, C, _, N = x.shape
    y = jnp.sum(x[:, :, 0, :] * weight.reshape(1, C, 1), axis=1) + bias[0]
    return y[:, None, None, :]


if __name__ == "__main__":
    key = jax.random.PRNGKey(0)

    # Primary small case, plus shapes exercising partial batch/lane blocks and
    # the split-channel (reduction grid axis + ragged mask) path.
    cases = [(2, 4, 16), (3, 20, 200), (2, 2500, 160)]
    for i, (B, C, N) in enumerate(cases):
        key, k_x, k_p = jax.random.split(key, 3)
        x = jax.random.normal(k_x, (B, C, 1, N), jnp.float32)
        weight, bias = _init_params(C, k_p)

        out = jax.block_until_ready(fully_conv(x, weight, bias))
        ref = _reference(x, weight, bias)

        assert out.shape == (B, 1, 1, N), f"bad output shape in case {i}"
        assert jnp.allclose(out, ref, atol=1e-4, rtol=1e-4), f"mismatch in case {i}"

    print("KERNEL_OK")
</pallas_src>

<mosaic_0001>
module attributes {stable_mosaic.version = 11 : i64} {
  func.func @kernel(%arg0: i32, %arg1: i32, %arg2: i32, %arg3: memref<4x1xf32, #tpu.memory_space<vmem>>, %arg4: memref<1xf32, #tpu.memory_space<smem>>, %arg5: memref<1x4x16xf32, #tpu.memory_space<vmem>>, %arg6: memref<1x1x16xf32, #tpu.memory_space<vmem>>) attributes {dimension_semantics = [#tpu.dimension_semantics<parallel>, #tpu.dimension_semantics<parallel>, #tpu.dimension_semantics<arbitrary>], iteration_bounds = array<i64: 2, 1, 1>, scalar_prefetch = 0 : i64, scratch_operands = 0 : i64, tpu.core_type = #tpu.core_type<tc>, window_params = [{transform_indices = @transform_0, window_bounds = array<i64: 4, 1>}, {transform_indices = @transform_1, window_bounds = array<i64: 1>}, {transform_indices = @transform_2, window_bounds = array<i64: 1, 4, 16>}, {transform_indices = @transform_3, window_bounds = array<i64: 1, 1, 16>}]} {
    %c0_i32 = arith.constant 0 : i32
    %0 = arith.cmpi eq, %arg2, %c0_i32 : i32
    %1 = arith.extui %0 : i1 to i32
    %c0_i32_0 = arith.constant 0 : i32
    %2 = arith.cmpi ne, %1, %c0_i32_0 : i32
    scf.if %2 {
      %cst_11 = arith.constant 0.000000e+00 : f32
      %13 = vector.broadcast %cst_11 : f32 to vector<1x1x16xf32>
      %c0_12 = arith.constant 0 : index
      %14 = memref.load %arg4[%c0_12] : memref<1xf32, #tpu.memory_space<smem>>
      %15 = vector.broadcast %14 : f32 to vector<1x1x16xf32>
      %16 = arith.addf %13, %15 : vector<1x1x16xf32>
      %c0_13 = arith.constant 0 : index
      %c0_14 = arith.constant 0 : index
      %c0_15 = arith.constant 0 : index
      %17 = vector.load %arg6[%c0_13, %c0_14, %c0_15] : memref<1x1x16xf32, #tpu.memory_space<vmem>>, vector<1x1x16xf32>
      tpu.vector_store %arg6[%c0_13, %c0_14, %c0_15], %16 {strides = array<i32>} : memref<1x1x16xf32, #tpu.memory_space<vmem>>, vector<1x1x16xf32>,
    } else {
    }
    %c0 = arith.constant 0 : index
    %c0_1 = arith.constant 0 : index
    %c0_2 = arith.constant 0 : index
    %3 = vector.load %arg5[%c0, %c0_1, %c0_2] : memref<1x4x16xf32, #tpu.memory_space<vmem>>, vector<1x4x16xf32>
    %c0_3 = arith.constant 0 : index
    %c0_4 = arith.constant 0 : index
    %4 = vector.load %arg3[%c0_3, %c0_4] : memref<4x1xf32, #tpu.memory_space<vmem>>, vector<4x1xf32>
    %5 = vector.shape_cast %4 : vector<4x1xf32> to vector<1x4x1xf32>
    %6 = vector.broadcast %5 : vector<1x4x1xf32> to vector<1x4x16xf32>
    %7 = arith.mulf %3, %6 : vector<1x4x16xf32>
    %c0_5 = arith.constant 0 : index
    %c0_6 = arith.constant 0 : index
    %c0_7 = arith.constant 0 : index
    %8 = vector.load %arg6[%c0_5, %c0_6, %c0_7] : memref<1x1x16xf32, #tpu.memory_space<vmem>>, vector<1x1x16xf32>
    %cst = arith.constant dense<0.000000e+00> : vector<1x16xf32>
    %9 = vector.multi_reduction <add>, %7, %cst [1] : vector<1x4x16xf32> to vector<1x16xf32>
    %10 = vector.shape_cast %9 : vector<1x16xf32> to vector<1x1x16xf32>
    %11 = arith.addf %8, %10 : vector<1x1x16xf32>
    %c0_8 = arith.constant 0 : index
    %c0_9 = arith.constant 0 : index
    %c0_10 = arith.constant 0 : index
    %12 = vector.load %arg6[%c0_8, %c0_9, %c0_10] : memref<1x1x16xf32, #tpu.memory_space<vmem>>, vector<1x1x16xf32>
    tpu.vector_store %arg6[%c0_8, %c0_9, %c0_10], %11 {strides = array<i32>} : memref<1x1x16xf32, #tpu.memory_space<vmem>>, vector<1x1x16xf32>,
    return
  }
  func.func @transform_0(%arg0: i32, %arg1: i32, %arg2: i32) -> (i32, i32) {
    %c0_i32 = arith.constant 0 : i32
    %c0_i32_0 = arith.constant 0 : i32
    return %arg2, %c0_i32 : i32, i32
  }
  func.func @transform_1(%arg0: i32, %arg1: i32, %arg2: i32) -> i32 {
    %c0_i32 = arith.constant 0 : i32
    %c0_i32_0 = arith.constant 0 : i32
    return %c0_i32 : i32
  }
  func.func @transform_2(%arg0: i32, %arg1: i32, %arg2: i32) -> (i32, i32, i32) {
    %c0_i32 = arith.constant 0 : i32
    return %arg0, %arg2, %arg1 : i32, i32, i32
  }
  func.func @transform_3(%arg0: i32, %arg1: i32, %arg2: i32) -> (i32, i32, i32) {
    %c0_i32 = arith.constant 0 : i32
    %c0_i32_0 = arith.constant 0 : i32
    return %arg0, %c0_i32, %arg1 : i32, i32, i32
  }
}

</mosaic_0001>

<bundles_post_ra>
// kernel: tpu_custom_call.1
= control target key start
LH: loop header
LB: loop body
LE: loop exit
PB: predicated region body
PF: predicated region fallthrough
CT: control target
= control target key end

     0   :  { %s646_s0 = inlined_call_operand.vmem [shape: f32[4,1], index: 0, kind: input, shape index: {}]   ;;  %s647_s1 = inlined_call_operand.<no memory space> [shape: f32[1], index: 1, kind: input, shape index: {}]   ;;  %s648_s2 = inlined_call_operand.vmem [shape: f32[2,4,16], index: 2, kind: input, shape index: {}]   ;;  %s649_s3 = inlined_call_operand.hbm [shape: f32[2,1,16], index: 3, kind: output, shape index: {}]  }
   0x1   :  { %8 = sst [smem:[#allocation2]] %s647_s1 }
   0x2   :  { %9 = vsyncpa [#allocation4], 0 }
   0x3   :  { %11 = vsyncpa [#allocation4 + $0x1], 0  ;;  %s529_s14 = smov 0   ;;  %s531_s15 = smov 0  }
   0x4   :  { %s533_s16 = smov 0   ;;  %s535_s17 = smov 0  }
   0x5   :  { %s537_s18 = smov 0   ;;  %s539_s19 = smov 0  }
   0x6 LB: > { %s357_s1 = sadd.s32 4294967295, %s502_s19   ;;  %s358_s20 = sadd.s32 4294967294, %s502_s19   ;;  %s502_s19 = sphi %s539_s19, %s17_s19   ;;  %s498_s18 = sphi %s537_s18, %s656_s18   ;;  %s494_s17 = sphi %s535_s17, %s655_s17   ;;  %s490_s16 = sphi %s533_s16, %s654_s16   ;;  %s486_s15 = sphi %s531_s15, %s653_s15   ;;  %s482_s14 = sphi %s529_s14, %s652_s14  }
   0x7   : > { %s36_s21 = sadd.s32 1, %s498_s18  ;;  %s122_s22 = sadd.s32 1, %s490_s16 }
   0x8   : > { %p38_p0 = scmp.ge.s32.totalorder %s36_s21, 2  ;;  %p132_p1 = scmp.ne.s32.totalorder %s490_s16, %s486_s15 }
   0x9   : > { %p133_p2 = scmp.eq.s32.totalorder %s357_s1, 1  ;;  %p138_p3 = scmp.ne.s32.totalorder %s486_s15, %s482_s14 }
   0xa   : > { %s658_s21 = smov (%p38_p0, %s36_s21), 0  ;;  %p139_p5 = scmp.eq.s32.totalorder %s358_s20, 1 }
   0xb   : > { %p569_p4 = por %p133_p2, %p132_p1  ;;  %s117_s24 = ssub.s32 %s498_s18, %s658_s21 }
   0xc   : > { %p362_p6 = scmp.ge.s32.totalorder %s502_s19, 1  ;;  %p120_p7 = scmp.eq.s32.totalorder %s117_s24, 0 }
   0xd   : > { %p576_p8 = por %p139_p5, %p138_p3  ;;  %p180_p9 = scmp.lt.s32.totalorder %s502_s19, 3 }
   0xe   : > { %s582_s26 = scalar_select %p120_p7, %s490_s16, %s122_s22  }
   0xf   : > { %p181_p10 = pnand %p362_p6, %p180_p9 }
  0x10   : > { %v236_v0 = vld [vmem:[%s646_s0] sm:$0xf] (!%p181_p10)  ;;  %v504_v1 = vmov (!%p181_p10), 0   ;;  %s230_s29 = sld [smem:[#allocation2]] (!%p181_p10)  ;;  %s210_s30 = sand.u32 (!%p181_p10), 1, %s486_s15   ;;  %vm233_vm0 = vcmask (!%p181_p10), 122880  }
  0x11   : > { %184 = sbr.rel (%p181_p10) target bundleno = 177 (0xb1), region = 32  ;;  %423 = vset.pattern.permute.xlu0 (!%p181_p10), %v504_v1  ;;  %s211_s4 = scalar_lea.vmem (!%p181_p10), [#allocation3], %s210_s30  ;;  %vm244_vm1 = vcmask (!%p181_p10), 125952  }
  0x12   : > { %239 = vperm.xlu0 (!%p181_p10), %423, %v236_v0   ;;  %p216_p11 = scmp.lt.s32.totalorder (!%p181_p10), %s494_s17, 1  ;;  %s364_s10 = sshll.u32 (!%p181_p10), %s494_s17, 4 }
  0x13   : > { %s269_s11 = sshll.u32 (!%p181_p10), %s211_s4, 4  ;;  %s598_s1 = scalar_lea.hbm (!%p181_p10), %s649_s3, %s364_s10  ;;  %s600_s11 = int_to_ptr.vmem [resolvable:$true] %s269_s11 }
  0x14   : > { %s256_s20 = scalar_lea.sflag (!%p181_p10), [#allocation4], %s210_s30  ;;  %s424_s22 = scalar_lea.vmem (!%p181_p10), %s600_s11, 16 }
  0x15   : > { %p425_p12 = scmp.ne.s32.totalorder (!%p181_p10), %s600_s11, %s424_s22 }
  0x16   : > { %v231_v2 = vstv (!%p181_p10), %s230_s29 }
  0x17   : > { %234 = vst.msk [vmem:[%s211_s4] sm:$0x1] (!%p181_p10), %vm233_vm0, %v231_v2  ;;  %p426_p13 = pnand (!%p181_p10), %p425_p12, %p569_p4 }
  0x18   : > { %s217_s5 = scalar_select %p216_p11, %s494_s17, 1 }
  0x19   : > { %p427_p0 = pneg %p426_p13  ;;  %s505_s17 = smov [#allocation3]  }
  0x1a   : > { %s363_s6 = sshll.u32 %s217_s5, 2  ;;  %s428_s24 = sshll.u32 %s505_s17, 4  ;;  %s429_s24 = int_to_ptr.vmem [resolvable:$false] %s428_s24 }
  0x1b   : > { %s225_s9 = scalar_lea.vmem %s648_s2, %s363_s6  ;;  %s430_s27 = scalar_lea.vmem %s429_s24, 32 }
  0x1c   : > { %v235_v3 = vld [vmem:[%s225_s9] sm:$0xf]  ;;  %p431_p1 = scmp.lt.s32.totalorder %s600_s11, %s429_s24  ;;  %p432_p2 = scmp.lt.s32.totalorder %s430_s27, %s424_s22 }
  0x1e   : > { %v243_v12 = vld [vmem:[%s211_s4] sm:$0x1]  ;;  %p433_p3 = por %p432_p2, %p431_p1 }
  0x20   : > { %p434_p5 = pnand %p433_p3, %p427_p0 }
  0x91   : > { %v240_v4 = vpop.permute.xlu0 %239 }
  0x92   : > { %v242_v5 = vmul.f32 %v240_v4, %v235_v3 }
  0x94   : > { %v245_v6 = vsel %vm244_vm1, %v242_v5, 0.0 }
  0x95   : > { %v246_v7 = vrot.slane %v245_v6, 4 }
  0x97   : > { %v247_v8 = vadd.f32 %v246_v7, %v245_v6 }
  0x99   : > { %v248_v9 = vrot.slane %v247_v8, 2 }
  0x9b   : > { %v249_v10 = vadd.f32 %v248_v9, %v247_v8 }
  0x9d   : > { %v250_v11 = vrot.slane %v249_v10, 1 }
  0x9f   : > { %v251_v13 = vadd.f32 %v250_v11, %v249_v10 }
  0xa1   : > { %v252_v14 = vadd.f32 %v251_v13, %v243_v12 }
  0xa3   : > { %254 = vst.msk [vmem:[%s211_s4] sm:$0x1] %vm233_vm0, %v252_v14 }
  0xa4   : > { %437 = shalt.err (!%p434_p5)
}
  0xa5   : > { %s438_s28 = scalar_lea.hbm %s598_s1, 16  ;;  %s442_s4 = scalar_lea.hbm %s649_s3, 32 }
  0xa6   : > { %p439_p6 = scmp.ne.s32.totalorder %s598_s1, %s438_s28  ;;  %p443_p10 = scmp.lt.u32.totalorder %s598_s1, %s649_s3 }
  0xa7   : > { %p444_p11 = scmp.lt.u32.totalorder %s442_s4, %s438_s28  ;;  %p446_p13 = scmp.lt.u32.totalorder %s438_s28, %s598_s1 }
  0xa8   : > { %p440_p7 = pnand %p439_p6, %p569_p4 }
  0xa9   : > { %p445_p12 = por %p444_p11, %p443_p10 }
  0xaa   : > { %p441_p9 = pneg %p440_p7 }
  0xab   : > { %p447_p0 = por %p446_p13, %p445_p12 }
  0xad   : > { %p448_p1 = pnand %p447_p0, %p441_p9 }
  0xaf   : > { %451 = shalt.err (!%p448_p1)
}
  0xb0   : > { %367 = dma.vmem_to_hbm [thread:$0]  (%p569_p4), %s600_s11, 16, %s598_s1, %s256_s20  }
  0xb1 PF: > { %p373_p2 = scmp.ge.s32.totalorder %s502_s19, 2  ;;  %s281_s7 = sand.u32 1, %s482_s14  }
  0xb2   : > { %s282_s8 = scalar_lea.sflag [#allocation4], %s281_s7 }
  0xb3   : > { %p370_p3 = pnand %p373_p2, %p576_p8 }
  0xb5   : > { %477 = dma.done.wait (!%p370_p3), %s282_s8, 16  }
  0xb6   : > { %479 = vsyncadd (!%p370_p3), %s282_s8, 4294967280  ;;  %s17_s19 = sadd.s32 1, %s502_s19   ;;  %s652_s14 = smov %s486_s15 }
  0xb7   : > { %p14_p5 = scmp.ge.s32.totalorder %s17_s19, 4   ;;  %s653_s15 = smov %s490_s16 }
  0xb8   : > { %s654_s16 = smov %s582_s26  ;;  %s655_s17 = smov %s498_s18 }
  0xb9   : > { %s656_s18 = smov %s658_s21  ;;  %16 = sbr.rel (!%p14_p5) target bundleno = 6 (0x6), region = 74 }
  0xc0   :  { %286 = vsyncpa [#allocation4], 1 }
  0xc1   :  { %288 = vsyncpa [#allocation4 + $0x1], 1 }

</bundles_post_ra>
